<compile_context>
chip_gen: v7x
topology: tpu7x:2x2x1
jax: 0.10.0
libtpu: 0.0.40
codegen_flags: <defaults>
</compile_context>

<pallas_src>
import functools

import numpy as np
import jax
import jax.numpy as jnp
from jax.experimental import pallas as pl
from jax.experimental.pallas import tpu as pltpu


# ----------------------------------------------------------------------------
# Synthetic Dict action space:  {"move": Box(shape=(3,)), "jump": Discrete(4)}
# Box contributes 2*3 = 6 outputs (mean + log_std), Discrete(4) contributes 4.
# ----------------------------------------------------------------------------
ACTION_SPACE = (("move", "box", 3), ("jump", "discrete", 4))

OBS_DIM = 32
HIDDEN = 32
LANES = 128            # fused hidden width (lane-dense)


def _num_outputs(action_space):
    n = 0
    for _, kind, size in action_space:
        n += 2 * size if kind == "box" else size
    return n


def _get_mask(action_space, num_outputs):
    """Python replica of WrappedRLLibModel.get_mask (static, trace-time)."""
    mask = np.ones((num_outputs,), dtype=bool)
    curr = 0
    new_output_dim = num_outputs
    for _, kind, size in action_space:
        if kind == "box":
            mask[curr + size: curr + 2 * size] = False
            curr += 2 * size
            new_output_dim -= size
        else:
            curr += size
    return mask, new_output_dim


NUM_OUTPUTS = _num_outputs(ACTION_SPACE)                     # 10
MASK, NEW_OUTPUT_DIM = _get_mask(ACTION_SPACE, NUM_OUTPUTS)  # keep 7 of 10
KEEP_IDX = np.nonzero(MASK)[0]                               # static indices
OUT_COLS = NEW_OUTPUT_DIM + 1                                # logits + value

# Static packing assumptions (review correctness note (a)).
assert OUT_COLS <= LANES, "fused logits+value must fit in one 128-lane tile"
assert 2 * HIDDEN <= LANES, "policy+value hidden concat must fit 128 lanes"

# Row layout of the packed weight slab (all lane-padded to 128 columns)
_R1 = (0, OBS_DIM)                          # layer-1 fused weights  (32, 128)
_R2 = (_R1[1], _R1[1] + LANES)              # layer-2 fused weights (128, 128)
_R3 = (_R2[1], _R2[1] + LANES)              # layer-3 fused weights (128, 128)
W_SLAB_ROWS = _R3[1]                        # 288


# ----------------------------------------------------------------------------
# Trace-time parameter packing (runs once, outside the kernel)
# ----------------------------------------------------------------------------
def pack_params(params, param_dtype=jnp.bfloat16):
    """Fold the static mask into the logits weights, fuse policy/value branches
    into one weight slab (288, 128, param_dtype) and one f32 bias slab (8, 128).

    param_dtype=bfloat16 halves the weight DMA and vreg pressure; the MXU still
    accumulates in f32 and tanh/bias stay f32 in-kernel (v5e-safe)."""
    (w1, b1, w2, b2, wl, bl, wv1, bv1, wv2, bv2, wv, bv) = params
    H, K = HIDDEN, NEW_OUTPUT_DIM

    wl_m = wl[:, KEEP_IDX]                  # (H, 7)   mask folded into weights
    bl_m = bl[:, KEEP_IDX]                  # (1, 7)

    # layer 1: [w1 | wv1 | 0]            -> (OBS_DIM, 128)
    w1f = jnp.zeros((OBS_DIM, LANES), jnp.float32)
    w1f = w1f.at[:, 0:H].set(w1).at[:, H:2 * H].set(wv1)
    b1f = jnp.zeros((1, LANES), jnp.float32)
    b1f = b1f.at[:, 0:H].set(b1).at[:, H:2 * H].set(bv1)

    # layer 2: block_diag(w2, wv2)       -> (128, 128)
    w2f = jnp.zeros((LANES, LANES), jnp.float32)
    w2f = w2f.at[0:H, 0:H].set(w2).at[H:2 * H, H:2 * H].set(wv2)
    b2f = jnp.zeros((1, LANES), jnp.float32)
    b2f = b2f.at[:, 0:H].set(b2).at[:, H:2 * H].set(bv2)

    # layer 3: [wl_masked | wv]          -> (128, 128), logits cols 0:7, value col 7
    w3f = jnp.zeros((LANES, LANES), jnp.float32)
    w3f = w3f.at[0:H, 0:K].set(wl_m).at[H:2 * H, K:K + 1].set(wv)
    b3f = jnp.zeros((1, LANES), jnp.float32)
    b3f = b3f.at[:, 0:K].set(bl_m).at[0, K].set(bv[0, 0])

    w_slab = jnp.concatenate([w1f, w2f, w3f], axis=0).astype(param_dtype)
    b_slab = jnp.zeros((8, LANES), jnp.float32)            # bias stays f32
    b_slab = b_slab.at[0:1].set(b1f).at[1:2].set(b2f).at[2:3].set(b3f)
    return w_slab, b_slab


# ----------------------------------------------------------------------------
# Kernel: 3 fused matmuls (bf16 or f32 operands, f32 accumulation) + 2 f32 tanh,
# narrow (tb, OUT_COLS) f32 output store.
# ----------------------------------------------------------------------------
def _fused_mlp_kernel(obs_ref, w_ref, b_ref, out_ref, *, r1, r2, r3, out_cols, cdt):
    obs = obs_ref[...].astype(cdt)                            # (tb, OBS_DIM)
    h = jnp.tanh(jnp.dot(obs, w_ref[r1[0]:r1[1], :],
                         preferred_element_type=jnp.float32) + b_ref[0:1, :])
    h = jnp.tanh(jnp.dot(h.astype(cdt), w_ref[r2[0]:r2[1], :],
                         preferred_element_type=jnp.float32) + b_ref[1:2, :])
    out = jnp.dot(h.astype(cdt), w_ref[r3[0]:r3[1], :],
                  preferred_element_type=jnp.float32) + b_ref[2:3, :]
    out_ref[...] = out[:, :out_cols]                          # (tb, 8) writeback


# ----------------------------------------------------------------------------
# Batch-tiling choice: large tiles (amortize per-step overhead), >=2 grid steps
# for big batches (v7x dual-TC), divisor tiles preferred (avoid jnp.pad copies).
# ----------------------------------------------------------------------------
def _round_up(x, m):
    return ((x + m - 1) // m) * m


def _choose_tiling(batch, max_block_rows, min_split_rows=1024):
    bp8 = _round_up(max(batch, 1), 8)
    cap = min(max_block_rows, bp8)
    if bp8 >= min_split_rows:
        # ensure at least 2 grid steps so the "parallel" axis can shard
        # across v7x's two TensorCores
        cap = min(cap, _round_up((bp8 + 1) // 2, 8))
    cap = max(cap, 8)
    # largest multiple-of-8 divisor of bp8 not exceeding cap (no pad needed)
    best_div = 8
    t = 8
    while t <= cap:
        if bp8 % t == 0:
            best_div = t
        t += 8
    tb = best_div if best_div * 4 >= cap else cap   # pad only if divisor is tiny
    bp = _round_up(bp8, tb)
    return tb, bp


def wrapped_rllib_model_forward(obs, w_slab, b_slab, *, max_block_rows=4096):
    """Returns (masked_logits, state, value) — state is [] like an FC net.
    Call under jax.jit so the tail slices fuse with surrounding ops."""
    B = obs.shape[0]
    tb, Bp = _choose_tiling(B, max_block_rows)
    if Bp != B:
        obs = jnp.pad(obs, ((0, Bp - B), (0, 0)))
    grid = (Bp // tb,)

    kernel = functools.partial(_fused_mlp_kernel, r1=_R1, r2=_R2, r3=_R3,
                               out_cols=OUT_COLS, cdt=w_slab.dtype)

    obs_itemsize = np.dtype(obs.dtype).itemsize
    w_bytes = int(np.prod(w_slab.shape)) * np.dtype(w_slab.dtype).itemsize
    b_bytes = int(np.prod(b_slab.shape)) * np.dtype(b_slab.dtype).itemsize
    cost = pl.CostEstimate(
        flops=2 * Bp * (OBS_DIM * LANES + 2 * LANES * LANES),
        transcendentals=2 * Bp * LANES,
        bytes_accessed=int(Bp * OBS_DIM * obs_itemsize
                           + Bp * OUT_COLS * 4 + w_bytes + b_bytes),
    )

    out = pl.pallas_call(
        kernel,
        out_shape=jax.ShapeDtypeStruct((Bp, OUT_COLS), jnp.float32),
        grid=grid,
        in_specs=[
            pl.BlockSpec((tb, OBS_DIM), lambda i: (i, 0)),
            pl.BlockSpec((W_SLAB_ROWS, LANES), lambda i: (0, 0)),   # resident
            pl.BlockSpec((8, LANES), lambda i: (0, 0)),             # resident
        ],
        out_specs=pl.BlockSpec((tb, OUT_COLS), lambda i: (i, 0)),
        compiler_params=pltpu.CompilerParams(
            dimension_semantics=("parallel",)),
        cost_estimate=cost,
    )(obs, w_slab, b_slab)

    masked_logits = out[:B, :NEW_OUTPUT_DIM]     # model_out[0][:, mask]
    value = out[:B, NEW_OUTPUT_DIM]              # value_function()
    state = []                                   # FC net carries no RNN state
    return masked_logits, state, value


# ----------------------------------------------------------------------------
# Deterministic parameter construction + pure-JAX reference for verification
# ----------------------------------------------------------------------------
def make_params(key):
    ks = jax.random.split(key, 12)
    s = 0.1
    w1 = s * jax.random.normal(ks[0], (OBS_DIM, HIDDEN), jnp.float32)
    b1 = s * jax.random.normal(ks[1], (1, HIDDEN), jnp.float32)
    w2 = s * jax.random.normal(ks[2], (HIDDEN, HIDDEN), jnp.float32)
    b2 = s * jax.random.normal(ks[3], (1, HIDDEN), jnp.float32)
    wl = s * jax.random.normal(ks[4], (HIDDEN, NUM_OUTPUTS), jnp.float32)
    bl = s * jax.random.normal(ks[5], (1, NUM_OUTPUTS), jnp.float32)
    wv1 = s * jax.random.normal(ks[6], (OBS_DIM, HIDDEN), jnp.float32)
    bv1 = s * jax.random.normal(ks[7], (1, HIDDEN), jnp.float32)
    wv2 = s * jax.random.normal(ks[8], (HIDDEN, HIDDEN), jnp.float32)
    bv2 = s * jax.random.normal(ks[9], (1, HIDDEN), jnp.float32)
    wv = s * jax.random.normal(ks[10], (HIDDEN, 1), jnp.float32)
    bv = s * jax.random.normal(ks[11], (1, 1), jnp.float32)
    return (w1, b1, w2, b2, wl, bl, wv1, bv1, wv2, bv2, wv, bv)


def reference_forward(obs, params, param_dtype=jnp.float32):
    """Pure-JAX reference; param_dtype quantizes weights like pack_params does
    (review note (b): compare the bf16 kernel against matching weight precision)."""
    q = lambda w: w.astype(param_dtype).astype(jnp.float32)
    (w1, b1, w2, b2, wl, bl, wv1, bv1, wv2, bv2, wv, bv) = params
    h1 = jnp.tanh(obs @ q(w1) + b1)
    h2 = jnp.tanh(h1 @ q(w2) + b2)
    logits = h2 @ q(wl) + bl
    masked = logits[:, KEEP_IDX]                 # model_out[0][:, mask]
    v1 = jnp.tanh(obs @ q(wv1) + bv1)
    v2 = jnp.tanh(v1 @ q(wv2) + bv2)
    value = (v2 @ q(wv) + bv)[:, 0]
    return masked, value


# TODO(synk): the checkpoint-loading / ONNX-export helper (export_onnx_from_policy)
# is host-side tooling with no Pallas equivalent; only forward()/value_function()
# are implemented here.

if __name__ == "__main__":
    key = jax.random.PRNGKey(0)
    k_obs, k_obs2, k_par = jax.random.split(key, 3)
    params = make_params(k_par)

    fwd = jax.jit(wrapped_rllib_model_forward)   # fuse tail slices with neighbors

    # ---- check 1: f32 slabs, batch=8 — exact match against the f32 reference
    w32, b32 = pack_params(params, param_dtype=jnp.float32)
    obs = jax.random.normal(k_obs, (8, OBS_DIM), jnp.float32)
    logits, state, value = fwd(obs, w32, b32)
    logits, value = jax.block_until_ready((logits, value))
    ref_logits, ref_value = reference_forward(obs, params)
    assert logits.shape == (8, NEW_OUTPUT_DIM)
    assert value.shape == (8,)
    assert state == []
    np.testing.assert_allclose(np.asarray(logits), np.asarray(ref_logits),
                               rtol=1e-5, atol=1e-5)
    np.testing.assert_allclose(np.asarray(value), np.asarray(ref_value),
                               rtol=1e-5, atol=1e-5)

    # ---- check 2: default bf16 slabs, ragged batch=20 (exercises pad/tiling)
    wbf, bbf = pack_params(params)               # bfloat16 weight slab
    obs2 = jax.random.normal(k_obs2, (20, OBS_DIM), jnp.float32)
    logits2, state2, value2 = fwd(obs2, wbf, bbf)
    logits2, value2 = jax.block_until_ready((logits2, value2))
    ref_logits2, ref_value2 = reference_forward(obs2, params,
                                                param_dtype=jnp.bfloat16)
    assert logits2.shape == (20, NEW_OUTPUT_DIM)
    assert value2.shape == (20,)
    assert state2 == []
    np.testing.assert_allclose(np.asarray(logits2), np.asarray(ref_logits2),
                               rtol=1e-2, atol=1e-2)
    np.testing.assert_allclose(np.asarray(value2), np.asarray(ref_value2),
                               rtol=1e-2, atol=1e-2)

    print("KERNEL_OK")
</pallas_src>

<mosaic_0001>
module attributes {stable_mosaic.version = 11 : i64} {
  func.func @_fused_mlp_kernel(%arg0: i32, %arg1: memref<8x32xf32, #tpu.memory_space<vmem>>, %arg2: memref<288x128xf32, #tpu.memory_space<vmem>>, %arg3: memref<8x128xf32, #tpu.memory_space<vmem>>, %arg4: memref<8x8xf32, #tpu.memory_space<vmem>>) attributes {dimension_semantics = [#tpu.dimension_semantics<parallel>], iteration_bounds = array<i64: 1>, scalar_prefetch = 0 : i64, scratch_operands = 0 : i64, tpu.core_type = #tpu.core_type<tc>, window_params = [{transform_indices = @transform_0, window_bounds = array<i64: 8, 32>}, {pipeline_mode = #tpu.pipeline_mode<synchronous>, transform_indices = @transform_1, window_bounds = array<i64: 288, 128>}, {pipeline_mode = #tpu.pipeline_mode<synchronous>, transform_indices = @transform_2, window_bounds = array<i64: 8, 128>}, {transform_indices = @transform_3, window_bounds = array<i64: 8, 8>}]} {
    %c0 = arith.constant 0 : index
    %c0_0 = arith.constant 0 : index
    %0 = vector.load %arg1[%c0, %c0_0] : memref<8x32xf32, #tpu.memory_space<vmem>>, vector<8x32xf32>
    %c0_1 = arith.constant 0 : index
    %c0_2 = arith.constant 0 : index
    %1 = vector.load %arg2[%c0_1, %c0_2] : memref<288x128xf32, #tpu.memory_space<vmem>>, vector<32x128xf32>
    %cst = arith.constant dense<0.000000e+00> : vector<8x128xf32>
    %2 = tpu.matmul %0, %1, %cst {dimension_numbers = #tpu.dot_dimension_numbers<[1], [0], [0], [1], [0, 0, 1, 1], [], []>} : vector<8x32xf32>, vector<32x128xf32>, vector<8x128xf32> -> vector<8x128xf32>
    %c0_3 = arith.constant 0 : index
    %c0_4 = arith.constant 0 : index
    %3 = vector.load %arg3[%c0_3, %c0_4] : memref<8x128xf32, #tpu.memory_space<vmem>>, vector<1x128xf32>
    %4 = vector.broadcast %3 : vector<1x128xf32> to vector<8x128xf32>
    %5 = arith.addf %2, %4 : vector<8x128xf32>
    %6 = math.tanh %5 : vector<8x128xf32>
    %c32 = arith.constant 32 : index
    %c0_5 = arith.constant 0 : index
    %7 = vector.load %arg2[%c32, %c0_5] : memref<288x128xf32, #tpu.memory_space<vmem>>, vector<128x128xf32>
    %cst_6 = arith.constant dense<0.000000e+00> : vector<8x128xf32>
    %8 = tpu.matmul %6, %7, %cst_6 {dimension_numbers = #tpu.dot_dimension_numbers<[1], [0], [0], [1], [0, 0, 1, 1], [], []>} : vector<8x128xf32>, vector<128x128xf32>, vector<8x128xf32> -> vector<8x128xf32>
    %c1 = arith.constant 1 : index
    %c0_7 = arith.constant 0 : index
    %9 = vector.load %arg3[%c1, %c0_7] : memref<8x128xf32, #tpu.memory_space<vmem>>, vector<1x128xf32>
    %10 = vector.broadcast %9 : vector<1x128xf32> to vector<8x128xf32>
    %11 = arith.addf %8, %10 : vector<8x128xf32>
    %12 = math.tanh %11 : vector<8x128xf32>
    %c160 = arith.constant 160 : index
    %c0_8 = arith.constant 0 : index
    %13 = vector.load %arg2[%c160, %c0_8] : memref<288x128xf32, #tpu.memory_space<vmem>>, vector<128x128xf32>
    %cst_9 = arith.constant dense<0.000000e+00> : vector<8x128xf32>
    %14 = tpu.matmul %12, %13, %cst_9 {dimension_numbers = #tpu.dot_dimension_numbers<[1], [0], [0], [1], [0, 0, 1, 1], [], []>} : vector<8x128xf32>, vector<128x128xf32>, vector<8x128xf32> -> vector<8x128xf32>
    %c2 = arith.constant 2 : index
    %c0_10 = arith.constant 0 : index
    %15 = vector.load %arg3[%c2, %c0_10] : memref<8x128xf32, #tpu.memory_space<vmem>>, vector<1x128xf32>
    %16 = vector.broadcast %15 : vector<1x128xf32> to vector<8x128xf32>
    %17 = arith.addf %14, %16 : vector<8x128xf32>
    %18 = vector.extract_strided_slice %17 {offsets = [0, 0], sizes = [8, 8], strides = [1, 1]} : vector<8x128xf32> to vector<8x8xf32>
    %c0_11 = arith.constant 0 : index
    %c0_12 = arith.constant 0 : index
    %19 = vector.load %arg4[%c0_11, %c0_12] : memref<8x8xf32, #tpu.memory_space<vmem>>, vector<8x8xf32>
    tpu.vector_store %arg4[%c0_11, %c0_12], %18 {strides = array<i32>} : memref<8x8xf32, #tpu.memory_space<vmem>>, vector<8x8xf32>,
    return
  }
  func.func @transform_0(%arg0: i32) -> (i32, i32) {
    %c0_i32 = arith.constant 0 : i32
    %c0_i32_0 = arith.constant 0 : i32
    return %arg0, %c0_i32 : i32, i32
  }
  func.func @transform_1(%arg0: i32) -> (i32, i32) {
    %c0_i32 = arith.constant 0 : i32
    %c0_i32_0 = arith.constant 0 : i32
    %c0_i32_1 = arith.constant 0 : i32
    return %c0_i32, %c0_i32_0 : i32, i32
  }
  func.func @transform_2(%arg0: i32) -> (i32, i32) {
    %c0_i32 = arith.constant 0 : i32
    %c0_i32_0 = arith.constant 0 : i32
    %c0_i32_1 = arith.constant 0 : i32
    return %c0_i32, %c0_i32_0 : i32, i32
  }
  func.func @transform_3(%arg0: i32) -> (i32, i32) {
    %c0_i32 = arith.constant 0 : i32
    %c0_i32_0 = arith.constant 0 : i32
    return %arg0, %c0_i32 : i32, i32
  }
}

</mosaic_0001>

<bundles_post_ra>
// kernel: wrapped_rllib_model_forward.1
= control target key start
LH: loop header
LB: loop body
LE: loop exit
PB: predicated region body
PF: predicated region fallthrough
CT: control target
= control target key end

     0   :  { %8 = vsyncpa [#allocation3], 0  ;;  %s675_s0 = inlined_call_operand.hbm [shape: f32[8,32], index: 0, kind: input, shape index: {}]   ;;  %s676_s1 = inlined_call_operand.hbm [shape: f32[288,128], index: 1, kind: input, shape index: {}]   ;;  %s677_s2 = inlined_call_operand.hbm [shape: f32[8,128], index: 2, kind: input, shape index: {}]   ;;  %s678_s3 = inlined_call_operand.vmem [shape: f32[8,8], index: 3, kind: output, shape index: {}]  }
   0x1   :  { %9 = vsyncpa [#allocation5], 0  ;;  %s587_s12 = smov [#allocation4]   ;;  %s517_s16 = scalar_lea.hbm %s676_s1, 4608 }
   0x2   :  { %s25_s13 = sshll.u32 %s587_s12, 4  ;;  %p518_p0 = scmp.ne.s32.totalorder %s676_s1, %s517_s16  ;;  %s26_s13 = int_to_ptr.vmem [resolvable:$true] %s25_s13 }
   0x3   :  { %p521_p1 = scmp.lt.u32.totalorder %s517_s16, %s676_s1 }
   0x5   :  { %p523_p2 = pnand %p521_p1, %p518_p0 }
   0x7   :  { %526 = shalt.err (!%p523_p2)
}
   0x8   :  { %s527_s21 = scalar_lea.vmem %s26_s13, 4608  ;;  %p532_p4 = scmp.lt.s32.totalorder %s26_s13, %s26_s13 }
   0x9   :  { %p528_p3 = scmp.ne.s32.totalorder %s26_s13, %s527_s21  ;;  %p533_p5 = scmp.lt.s32.totalorder %s527_s21, %s527_s21 }
   0xb   :  { %p534_p6 = por %p533_p5, %p532_p4 }
   0xd   :  { %p535_p7 = pnand %p534_p6, %p528_p3 }
   0xf   :  { %538 = shalt.err (!%p535_p7)
}
  0x10   :  { %s588_s22 = smov 128   ;;  %s589_s23 = smov 8  }
  0x11   :  { %31 = dma.hbm_to_vmem [thread:$0]  %s676_s1, 4608, %s26_s13, [#allocation5], %s588_s22, %s588_s22, %s589_s23  }
  0x12   :  { %s590_s26 = smov [#allocation2]   ;;  %s591_s28 = smov [#allocation6]  }
  0x13   :  { %s16_s27 = sshll.u32 %s590_s26, 4  ;;  %s38_s29 = sshll.u32 %s591_s28, 4  ;;  %s17_s27 = int_to_ptr.vmem [resolvable:$true] %s16_s27  ;;  %s39_s29 = int_to_ptr.vmem [resolvable:$true] %s38_s29 }
  0x14   :  { %s539_s5 = scalar_lea.hbm %s675_s0, 128 }
  0x15   :  { %p540_p8 = scmp.ne.s32.totalorder %s675_s0, %s539_s5  ;;  %p543_p9 = scmp.lt.u32.totalorder %s539_s5, %s675_s0 }
  0x17   :  { %p545_p10 = pnand %p543_p9, %p540_p8 }
  0x19   :  { %548 = shalt.err (!%p545_p10)
}
  0x1a   :  { %s549_s1 = scalar_lea.vmem %s17_s27, 128  ;;  %p554_p12 = scmp.lt.s32.totalorder %s17_s27, %s17_s27 }
  0x1b   :  { %p550_p11 = scmp.ne.s32.totalorder %s17_s27, %s549_s1  ;;  %p555_p13 = scmp.lt.s32.totalorder %s549_s1, %s549_s1 }
  0x1d   :  { %p556_p0 = por %p555_p13, %p554_p12 }
  0x1f   :  { %p557_p1 = pnand %p556_p0, %p550_p11 }
  0x21   :  { %560 = shalt.err (!%p557_p1)
}
  0x22   :  { %19 = dma.hbm_to_vmem [thread:$0]  %s675_s0, 128, %s17_s27, [#allocation3]  }
  0x23   :  { %s561_s14 = scalar_lea.hbm %s677_s2, 128 }
  0x24   :  { %p562_p2 = scmp.ne.s32.totalorder %s677_s2, %s561_s14  ;;  %p565_p3 = scmp.lt.u32.totalorder %s561_s14, %s677_s2 }
  0x26   :  { %p567_p4 = pnand %p565_p3, %p562_p2 }
  0x28   :  { %570 = shalt.err (!%p567_p4)
}
  0x29   :  { %s571_s19 = scalar_lea.vmem %s39_s29, 128  ;;  %p576_p6 = scmp.lt.s32.totalorder %s39_s29, %s39_s29 }
  0x2a   :  { %p572_p5 = scmp.ne.s32.totalorder %s39_s29, %s571_s19  ;;  %p577_p7 = scmp.lt.s32.totalorder %s571_s19, %s571_s19 }
  0x2c   :  { %p578_p8 = por %p577_p7, %p576_p6 }
  0x2e   :  { %p579_p9 = pnand %p578_p8, %p572_p5 }
  0x30   :  { %582 = shalt.err (!%p579_p9)
}
  0x31   :  { %41 = dma.hbm_to_vmem [thread:$0]  %s677_s2, 128, %s39_s29, [#allocation5]  }
  0x32   :  { %583 = dma.done.wait [#allocation3], 128  }
  0x33   :  { %584 = vsyncadd [#allocation3], 4294967168 }
  0x34   :  { %585 = dma.done.wait [#allocation5], 4736  }
  0x35   :  { %586 = vsyncadd [#allocation5], 4294962560  ;;  %v592_v0 = vmov 0.0|0.0   ;;  %vm593_vm0 = vmmov 0   ;;  %v594_v1 = vmov 0.0   ;;  %v52_v2 = vld [vmem:[#allocation4] sm:$0xff] }
  0x36   :  { %451 = vmatprep.subr.bf16.mxu0 %v592_v0  ;;  %378 = vmatprep.mubr.msk.f32.mxu0 %vm593_vm0, %v594_v1  ;;  %v53_v3 = vld [vmem:[#allocation4 + $0x8] sm:$0xff]  ;;  %v54_v4 = vld [vmem:[#allocation4 + $0x10] sm:$0xff]  ;;  %v55_v6 = vld [vmem:[#allocation4 + $0x18] sm:$0xff]  ;;  %vm61_vm1 = vcmask 261120   ;;  %vm319_vm2 = vcmask 64512  }
  0x37   :  { %457 = vmatprep.subr.bf16.mxu1 %v592_v0  ;;  %413 = vmatprep.mubr.msk.f32.mxu1 %vm593_vm0, %v594_v1  ;;  %v452_v5 = vpack.c.bf16 %v53_v3, %v52_v2  ;;  %v136_v7 = vld [vmem:[#allocation4 + $0x20] sm:$0xff]  ;;  %v137_v8 = vld [vmem:[#allocation4 + $0x28] sm:$0xff]  ;;  %v138_v9 = vld [vmem:[#allocation4 + $0x30] sm:$0xff]  ;;  %v455_v11 = vpack.c.bf16 %v55_v6, %v54_v4 }
  0x38   :  { %v139_v10 = vld [vmem:[#allocation4 + $0x38] sm:$0xff]  ;;  %v458_v12 = vpack.c.bf16 %v137_v8, %v136_v7  ;;  %v140_v14 = vld [vmem:[#allocation4 + $0x40] sm:$0xff]  ;;  %v141_v15 = vld [vmem:[#allocation4 + $0x48] sm:$0xff] }
  0x39   :  { %453 = vmatpush3.bf16.msra.mxu0 %v452_v5  ;;  %v461_v13 = vpack.c.bf16 %v139_v10, %v138_v9  ;;  %v51_v16 = vld [vmem:[#allocation2] sm:$0xff]  ;;  %v464_v17 = vpack.c.bf16 %v141_v15, %v140_v14  ;;  %v142_v18 = vld [vmem:[#allocation4 + $0x50] sm:$0xff]  ;;  %v144_v21 = vld [vmem:[#allocation4 + $0x60] sm:$0xff] }
  0x3a   :  { %454 = vmatprep.subr.bf16.mxu0 %v592_v0  ;;  %459 = vmatpush3.bf16.msra.mxu1 %v458_v12  ;;  %v143_v19 = vld [vmem:[#allocation4 + $0x58] sm:$0xff]  ;;  %v145_v22 = vld [vmem:[#allocation4 + $0x68] sm:$0xff]  ;;  %v146_v24 = vld [vmem:[#allocation4 + $0x70] sm:$0xff] }
  0x3b   :  { %460 = vmatprep.subr.bf16.mxu1 %v592_v0  ;;  %v467_v20 = vpack.c.bf16 %v143_v19, %v142_v18  ;;  %v470_v23 = vpack.c.bf16 %v145_v22, %v144_v21  ;;  %v147_v25 = vld [vmem:[#allocation4 + $0x78] sm:$0xff]  ;;  %v148_v27 = vld [vmem:[#allocation4 + $0x80] sm:$0xff]  ;;  %v149_v28 = vld [vmem:[#allocation4 + $0x88] sm:$0xff] }
  0x3c   :  { %v473_v26 = vpack.c.bf16 %v147_v25, %v146_v24  ;;  %v476_v29 = vpack.c.bf16 %v149_v28, %v148_v27  ;;  %v150_v30 = vld [vmem:[#allocation4 + $0x90] sm:$0xff]  ;;  %v151_v31 = vld [vmem:[#allocation4 + $0x98] sm:$0xff]  ;;  %v228_v33 = vld [vmem:[#allocation4 + $0xa0] sm:$0xff] }
  0x3d   :  { %456 = vmatpush3.bf16.msra.mxu0 %v455_v11  ;;  %v479_v32 = vpack.c.bf16 %v151_v31, %v150_v30  ;;  %v229_v34 = vld [vmem:[#allocation4 + $0xa8] sm:$0xff]  ;;  %v230_v35 = vld [vmem:[#allocation4 + $0xb0] sm:$0xff]  ;;  %v231_v37 = vld [vmem:[#allocation4 + $0xb8] sm:$0xff] }
  0x3e   :  { %481 = vmatprep.subr.bf16.mxu0 %v592_v0  ;;  %462 = vmatpush3.bf16.msra.mxu1 %v461_v13  ;;  %v482_v36 = vpack.c.bf16 %v229_v34, %v228_v33  ;;  %v485_v38 = vpack.c.bf16 %v231_v37, %v230_v35  ;;  %v232_v39 = vld [vmem:[#allocation4 + $0xc0] sm:$0xff]  ;;  %v233_v40 = vld [vmem:[#allocation4 + $0xc8] sm:$0xff]  ;;  %v234_v42 = vld [vmem:[#allocation4 + $0xd0] sm:$0xff] }
  0x3f   :  { %463 = vmatprep.subr.bf16.mxu1 %v592_v0  ;;  %v488_v41 = vpack.c.bf16 %v233_v40, %v232_v39  ;;  %v235_v43 = vld [vmem:[#allocation4 + $0xd8] sm:$0xff]  ;;  %v236_v45 = vld [vmem:[#allocation4 + $0xe0] sm:$0xff]  ;;  %v237_v46 = vld [vmem:[#allocation4 + $0xe8] sm:$0xff] }
  0x40   :  { %379 = vmatmul.mubr.msk.f32.vlgmr.msra.gmra.mrb[0].mxu0 %vm61_vm1, %v51_v16  ;;  %v491_v44 = vpack.c.bf16 %v235_v43, %v234_v42  ;;  %v494_v47 = vpack.c.bf16 %v237_v46, %v236_v45  ;;  %v327_v48 = vld [vmem:[#allocation6] ss:$0 sm:$0xff]  ;;  %v238_v53 = vld [vmem:[#allocation4 + $0xf0] sm:$0xff]  ;;  %v239_v54 = vld [vmem:[#allocation4 + $0xf8] sm:$0xff] }
  0x41   :  { %448 = vmatprep.mubr.msk.f32.mxu0 %vm593_vm0, %v594_v1  ;;  %483 = vmatpush3.bf16.msra.mxu0 %v482_v36  ;;  %v497_v55 = vpack.c.bf16 %v239_v54, %v238_v53  ;;  %v240_v56 = vld [vmem:[#allocation4 + $0x100] sm:$0xff]  ;;  %v241_v57 = vld [vmem:[#allocation4 + $0x108] sm:$0xff]  ;;  %v242_v59 = vld [vmem:[#allocation4 + $0x110] sm:$0xff] }
  0x42   :  { %465 = vmatpush3.bf16.msra.mxu1 %v464_v17  ;;  %484 = vmatprep.subr.bf16.mxu0 %v592_v0  ;;  %v500_v58 = vpack.c.bf16 %v241_v57, %v240_v56  ;;  %v243_v60 = vld [vmem:[#allocation4 + $0x118] sm:$0xff]  ;;  %v329_v62 = vld [vmem:[#allocation6 + $0x1] ss:$0 sm:$0xff]  ;;  %v330_v4 = vld [vmem:[#allocation6 + $0x2] ss:$0 sm:$0xff] }
  0x43   :  { %466 = vmatprep.subr.bf16.mxu1 %v592_v0  ;;  %v503_v61 = vpack.c.bf16 %v243_v60, %v242_v59 }
  0x45   :  { %486 = vmatpush3.bf16.msra.mxu0 %v485_v38 }
  0x46   :  { %468 = vmatpush3.bf16.msra.mxu1 %v467_v20  ;;  %487 = vmatprep.subr.bf16.mxu0 %v592_v0 }
  0x47   :  { %469 = vmatprep.subr.bf16.mxu1 %v592_v0 }
  0x49   :  { %489 = vmatpush3.bf16.msra.mxu0 %v488_v41 }
  0x4a   :  { %471 = vmatpush3.bf16.msra.mxu1 %v470_v23  ;;  %490 = vmatprep.subr.bf16.mxu0 %v592_v0 }
  0x4b   :  { %472 = vmatprep.subr.bf16.mxu1 %v592_v0 }
  0x4d   :  { %492 = vmatpush3.bf16.msra.mxu0 %v491_v44 }
  0x4e   :  { %474 = vmatpush3.bf16.msra.mxu1 %v473_v26  ;;  %493 = vmatprep.subr.bf16.mxu0 %v592_v0 }
  0x4f   :  { %475 = vmatprep.subr.bf16.mxu1 %v592_v0 }
  0x51   :  { %495 = vmatpush3.bf16.msra.mxu0 %v494_v47 }
  0x52   :  { %477 = vmatpush3.bf16.msra.mxu1 %v476_v29  ;;  %496 = vmatprep.subr.bf16.mxu0 %v592_v0 }
  0x53   :  { %478 = vmatprep.subr.bf16.mxu1 %v592_v0 }
  0x55   :  { %498 = vmatpush3.bf16.msra.mxu0 %v497_v55 }
  0x56   :  { %480 = vmatpush3.bf16.msra.mxu1 %v479_v32  ;;  %499 = vmatprep.subr.bf16.mxu0 %v592_v0 }
  0x59   :  { %501 = vmatpush3.bf16.msra.mxu0 %v500_v58 }
  0x5a   :  { %502 = vmatprep.subr.bf16.mxu0 %v592_v0 }
  0x5d   :  { %504 = vmatpush3.bf16.msra.mxu0 %v503_v61 }
 0x113   :  { %v131_v49 = vpop.f32.mrb[0].mxu0 }
 0x114   :  { %v132_v50 = vadd.f32 %v327_v48, %v131_v49  ;;  %v380_v51 = vpop.f32.mrb[1].mxu0 }
 0x116   :  { %513 = vtanh.f32 %v132_v50 }
 0x120   :  { %v514_v52 = vpop.eup %513 }
 0x121   :  { %414 = vmatmul.mubr.f32.vlgmr.msra.gmra.mrb[0].mxu1 %v514_v52 }
 0x1f4   :  { %v223_v63 = vpop.f32.mrb[0].mxu1 }
 0x1f5   :  { %v224_v1 = vadd.f32 %v329_v62, %v223_v63  ;;  %v415_v2 = vpop.f32.mrb[1].mxu1 }
 0x1f7   :  { %515 = vtanh.f32 %v224_v1 }
 0x201   :  { %v516_v3 = vpop.eup %515 }
 0x202   :  { %449 = vmatmul.mubr.f32.vlgmr.msra.gmra.mrb[2].mxu0 %v516_v3 }
 0x2d5   :  { %v315_v5 = vpop.f32.mrb[2].mxu0 }
 0x2d6   :  { %v316_v6 = vadd.f32 %v330_v4, %v315_v5  ;;  %v450_v7 = vpop.f32.mrb[3].mxu0 }
 0x2d8   :  { %320 = vst.msk [vmem:[%s678_s3] sm:$0xff] %vm319_vm2, %v316_v6 }
 0x2d9   :  { %325 = vsyncpa [#allocation3], 1 }
 0x2da   :  { %326 = vsyncpa [#allocation5], 1 }

</bundles_post_ra>
